<compile_context>
chip_gen: v7x
topology: tpu7x:2x2x1
jax: 0.10.0
libtpu: 0.0.40
codegen_flags: <defaults>
</compile_context>

<pallas_src>
import functools

import jax
import jax.numpy as jnp
from jax.experimental import pallas as pl
from jax.experimental.pallas import tpu as pltpu


# ---------------------------------------------------------------------------
# Kernel
# ---------------------------------------------------------------------------
def _demosaic_bilinear_kernel(tile_ref, bayer_hbm, out_ref, halo_ref, sem,
                              *, h, tile_h, multi_tile):
    # tile_ref : (1, tile_h, W) VMEM block of the Bayer plane, values in [0,1]
    # bayer_hbm: (N, H, W)      full Bayer plane left in HBM (halo rows only)
    # out_ref  : (1, 3, tile_h, W) BGR output block
    # halo_ref : (2, 1, W) VMEM scratch for the rows above / below the tile
    b = pl.program_id(0)
    i = pl.program_id(1)
    t = tile_h
    w = tile_ref.shape[2]
    row0 = i * t

    # ---- kick off the (tiny) halo-row DMAs; they overlap the work below ----
    if multi_tile:
        top_row = jnp.maximum(row0 - 1, 0)        # global row just above tile
        bot_row = jnp.minimum(row0 + t, h - 1)    # global row just below tile
        top_cp = pltpu.make_async_copy(
            bayer_hbm.at[b, pl.ds(top_row, 1), :], halo_ref.at[0], sem.at[0])
        bot_cp = pltpu.make_async_copy(
            bayer_hbm.at[b, pl.ds(bot_row, 1), :], halo_ref.at[1], sem.at[1])
        top_cp.start()
        bot_cp.start()

    # ---- helpers ------------------------------------------------------------
    def hshift(x, d, cols):
        # result[., c] = x[., c + d]; zero where c + d falls outside the image.
        n = x.shape[-1]
        rolled = pltpu.roll(x, shift=(-d) % n, axis=x.ndim - 1)  # shift >= 0
        if d > 0:
            return jnp.where(cols >= n - d, 0.0, rolled)
        return jnp.where(cols < -d, 0.0, rolled)

    def hfilt_rb(x, cols):
        # [0.5, 1.0, 0.5] horizontal filter (zero beyond the image columns).
        return x + 0.5 * (hshift(x, 1, cols) + hshift(x, -1, cols))

    def vshift(x, d, edge_row, rows):
        # result[r] = x[r + d]; rows shifted in from outside use edge_row (1,W).
        n = x.shape[0]
        rolled = pltpu.roll(x, shift=(-d) % n, axis=0)           # shift >= 0
        if d > 0:
            return jnp.where(rows >= n - d, edge_row, rolled)
        return jnp.where(rows < -d, edge_row, rolled)

    # ---- pre-mask the tile into R/G/B planes (x255 folded into the masks) ---
    # RGGB: R at (even,even), G at mixed parity, B at (odd,odd).  tile_h is a
    # multiple of 8 whenever there is more than one tile, so local row parity
    # equals global row parity.  Iotas hoisted and reused by every shift.
    row_idx = jax.lax.broadcasted_iota(jnp.int32, (t, w), 0)
    col_idx = jax.lax.broadcasted_iota(jnp.int32, (t, w), 1)
    row_par = row_idx & 1
    col_par = col_idx & 1

    p = tile_ref[0]                                         # (t, w) in [0, 1]
    rp = jnp.where((row_par == 0) & (col_par == 0), 255.0, 0.0) * p
    bp = jnp.where((row_par == 1) & (col_par == 1), 255.0, 0.0) * p
    gp = jnp.where(row_par != col_par, 255.0, 0.0) * p

    # Horizontal pass (bulk of the per-tile VALU work -> hides the halo DMA).
    hr = hfilt_rb(rp, col_idx)                      # h-filtered R plane
    hb = hfilt_rb(bp, col_idx)                      # h-filtered B plane
    gh = hshift(gp, 1, col_idx) + hshift(gp, -1, col_idx)   # left+right G

    zrow = jnp.zeros((1, w), jnp.float32)

    # ---- halo rows: row above is odd-parity, row below is even-parity -------
    if multi_tile:
        top_cp.wait()
        bot_cp.wait()
        valid_top = jnp.where(i > 0, 1.0, 0.0)
        valid_bot = jnp.where(row0 + t < h, 1.0, 0.0)
        top = halo_ref[0] * valid_top          # (1, w), zeroed at image top
        bot = halo_ref[1] * valid_bot          # (1, w), zeroed at image bottom
        hcol = jax.lax.broadcasted_iota(jnp.int32, (1, w), 1)
        hcol_par = hcol & 1
        # odd row above the tile: G on even cols, B on odd cols, no R
        gp_top = jnp.where(hcol_par == 0, 255.0, 0.0) * top
        hb_top = hfilt_rb(jnp.where(hcol_par == 1, 255.0, 0.0) * top, hcol)
        # even row below the tile: R on even cols, G on odd cols, no B
        gp_bot = jnp.where(hcol_par == 1, 255.0, 0.0) * bot
        hr_bot = hfilt_rb(jnp.where(hcol_par == 0, 255.0, 0.0) * bot, hcol)
    else:
        gp_top = hb_top = gp_bot = hr_bot = zrow

    # ---- vertical pass -------------------------------------------------------
    acc_r = hr + 0.5 * (vshift(hr, -1, zrow, row_idx)
                        + vshift(hr, 1, hr_bot, row_idx))
    acc_b = hb + 0.5 * (vshift(hb, -1, hb_top, row_idx)
                        + vshift(hb, 1, zrow, row_idx))
    acc_g = gp + 0.25 * (gh + vshift(gp, -1, gp_top, row_idx)
                         + vshift(gp, 1, gp_bot, row_idx))

    # TODO(synk): the exact dm.Demosaic 10-bit -> 8-bit scaling/rounding is not
    # observable from the module source; emulate an 8-bit integer output by
    # rounding + clipping before the final /255.0.
    def to_unit(x):
        return jnp.clip(jnp.round(x), 0.0, 255.0) * (1.0 / 255.0)

    out_ref[0, 0] = to_unit(acc_b)   # B
    out_ref[0, 1] = to_unit(acc_g)   # G
    out_ref[0, 2] = to_unit(acc_r)   # R


# ---------------------------------------------------------------------------
# Tile sizing / VMEM budgeting
# ---------------------------------------------------------------------------
_LIVE_SLABS = 20  # ~double-buffered in/out blocks + temporaries, each (tile_h, W) f32


def _vmem_limit_bytes():
    phys = 64 * 1024 * 1024            # conservative default (v7x physical VMEM)
    try:
        info = pltpu.get_tpu_info()
        phys = int(getattr(info, "vmem_capacity_bytes", phys))
    except Exception:
        pass
    return min(int(phys * 0.75), phys - 8 * 1024 * 1024)


def _pick_tile_h(h, w, vmem_limit):
    budget = int(vmem_limit * 0.6)
    max_rows = max(budget // (_LIVE_SLABS * w * 4), 8)
    if h <= max_rows:
        return h
    t = (max_rows // 8) * 8
    while t >= 8:
        if h % t == 0:                 # multiple of 8 keeps row parity & tiling rules
            return t
        t -= 8
    return h                           # no clean divisor: fall back to one tile/image


# ---------------------------------------------------------------------------
# Wrapper
# ---------------------------------------------------------------------------
def origin_demos_bilinear(img, *, tile_h=None):
    """img: (N, 1, H, W) float Bayer RGGB mosaic in [0,1] -> (N, 3, H, W) BGR."""
    n, c, h, w = img.shape
    assert c == 1, "Bayer mosaic input must be single-channel"
    bayer = img[:, 0, :, :].astype(jnp.float32)        # (N, H, W)

    vmem_limit = _vmem_limit_bytes()
    if tile_h is None:
        tile_h = _pick_tile_h(h, w, vmem_limit)
    assert h % tile_h == 0 and (tile_h == h or tile_h % 8 == 0)
    nt = h // tile_h
    multi_tile = nt > 1

    kernel = functools.partial(_demosaic_bilinear_kernel,
                               h=h, tile_h=tile_h, multi_tile=multi_tile)

    return pl.pallas_call(
        kernel,
        out_shape=jax.ShapeDtypeStruct((n, 3, h, w), jnp.float32),
        grid=(n, nt),
        in_specs=[
            pl.BlockSpec((1, tile_h, w), lambda b, i: (b, i, 0)),   # pipelined tile
            pl.BlockSpec(memory_space=pl.ANY),                      # raw HBM (halo rows)
        ],
        out_specs=pl.BlockSpec((1, 3, tile_h, w), lambda b, i: (b, 0, i, 0)),
        scratch_shapes=[
            pltpu.VMEM((2, 1, w), jnp.float32),                     # halo rows
            pltpu.SemaphoreType.DMA((2,)),
        ],
        compiler_params=pltpu.CompilerParams(
            dimension_semantics=("parallel", "parallel"),
            vmem_limit_bytes=vmem_limit,
        ),
    )(bayer, bayer)


# ---------------------------------------------------------------------------
# Pure-JAX reference (ported 9-tap masked convolution) for a smoke check
# ---------------------------------------------------------------------------
def _reference(img):
    n, _, h, w = img.shape
    p = jnp.pad(img[:, 0].astype(jnp.float32) * 255.0, ((0, 0), (1, 1), (1, 1)))
    ri = jnp.arange(h)[:, None]
    ci = jnp.arange(w)[None, :]
    k_g = ((0.0, 0.25, 0.0), (0.25, 1.0, 0.25), (0.0, 0.25, 0.0))
    k_rb = ((0.25, 0.5, 0.25), (0.5, 1.0, 0.5), (0.25, 0.5, 0.25))
    acc_r = jnp.zeros((n, h, w), jnp.float32)
    acc_g = jnp.zeros((n, h, w), jnp.float32)
    acc_b = jnp.zeros((n, h, w), jnp.float32)
    for dr in range(3):
        for dc in range(3):
            src = p[:, dr:dr + h, dc:dc + w]
            spr = (ri + dr + 1) % 2
            spc = (ci + dc + 1) % 2
            r_sel = (spr == 0) & (spc == 0)
            b_sel = (spr == 1) & (spc == 1)
            g_sel = spr != spc
            acc_r = acc_r + k_rb[dr][dc] * jnp.where(r_sel, src, 0.0)
            acc_b = acc_b + k_rb[dr][dc] * jnp.where(b_sel, src, 0.0)
            acc_g = acc_g + k_g[dr][dc] * jnp.where(g_sel, src, 0.0)

    def u(x):
        return jnp.clip(jnp.round(x), 0.0, 255.0) / 255.0

    return jnp.stack([u(acc_b), u(acc_g), u(acc_r)], axis=1)


if __name__ == "__main__":
    key = jax.random.PRNGKey(0)
    x = jax.random.uniform(key, (2, 1, 16, 16), dtype=jnp.float32)  # (N, C=1, H, W)

    out = origin_demos_bilinear(x)                 # single-tile path
    out = jax.block_until_ready(out)
    assert out.shape == (2, 3, 16, 16)
    assert out.dtype == jnp.float32
    assert bool(jnp.all(jnp.isfinite(out)))
    assert bool(jnp.all(out >= 0.0)) and bool(jnp.all(out <= 1.0))

    ref = jax.block_until_ready(_reference(x))
    tol = 1.0 / 255.0 + 1e-5
    err = float(jnp.max(jnp.abs(out - ref)))
    assert err <= tol, f"single-tile max err {err}"

    out_tiled = origin_demos_bilinear(x, tile_h=8)  # exercise halo-DMA / multi-tile path
    out_tiled = jax.block_until_ready(out_tiled)
    err_t = float(jnp.max(jnp.abs(out_tiled - ref)))
    assert err_t <= tol, f"tiled max err {err_t}"

    print("KERNEL_OK")
</pallas_src>

<mosaic_0001>
module attributes {stable_mosaic.version = 11 : i64} {
  func.func @_demosaic_bilinear_kernel(%arg0: i32, %arg1: i32, %arg2: memref<1x16x16xf32, #tpu.memory_space<vmem>>, %arg3: memref<2x16x16xf32, #tpu.memory_space<any>>, %arg4: memref<1x3x16x16xf32, #tpu.memory_space<vmem>>, %arg5: memref<2x1x16xf32, #tpu.memory_space<vmem>>, %arg6: memref<2x!tpu.dma_semaphore, #tpu.memory_space<semaphore_mem>>) attributes {dimension_semantics = [#tpu.dimension_semantics<parallel>, #tpu.dimension_semantics<parallel>], iteration_bounds = array<i64: 2, 1>, scalar_prefetch = 0 : i64, scratch_operands = 2 : i64, tpu.core_type = #tpu.core_type<tc>, window_params = [{transform_indices = @transform_0, window_bounds = array<i64: 1, 16, 16>}, {}, {transform_indices = @transform_2, window_bounds = array<i64: 1, 3, 16, 16>}]} {
    %0 = tpu.iota {dimensions = array<i32: 0>} : vector<16x16xi32>
    %1 = tpu.iota {dimensions = array<i32: 1>} : vector<16x16xi32>
    %c1_i32 = arith.constant 1 : i32
    %2 = vector.broadcast %c1_i32 : i32 to vector<16x16xi32>
    %3 = arith.andi %0, %2 : vector<16x16xi32>
    %c1_i32_0 = arith.constant 1 : i32
    %4 = vector.broadcast %c1_i32_0 : i32 to vector<16x16xi32>
    %5 = arith.andi %1, %4 : vector<16x16xi32>
    %c0 = arith.constant 0 : index
    %c0_1 = arith.constant 0 : index
    %c0_2 = arith.constant 0 : index
    %6 = vector.load %arg2[%c0, %c0_1, %c0_2] : memref<1x16x16xf32, #tpu.memory_space<vmem>>, vector<1x16x16xf32>
    %7 = vector.shape_cast %6 : vector<1x16x16xf32> to vector<16x16xf32>
    %c0_i32 = arith.constant 0 : i32
    %8 = vector.broadcast %c0_i32 : i32 to vector<16x16xi32>
    %9 = arith.cmpi eq, %3, %8 : vector<16x16xi32>
    %c0_i32_3 = arith.constant 0 : i32
    %10 = vector.broadcast %c0_i32_3 : i32 to vector<16x16xi32>
    %11 = arith.cmpi eq, %5, %10 : vector<16x16xi32>
    %12 = arith.andi %9, %11 : vector<16x16xi1>
    %cst = arith.constant 2.550000e+02 : f32
    %cst_4 = arith.constant 0.000000e+00 : f32
    %13 = vector.broadcast %cst : f32 to vector<16x16xf32>
    %14 = vector.broadcast %cst_4 : f32 to vector<16x16xf32>
    %15 = arith.select %12, %13, %14 : vector<16x16xi1>, vector<16x16xf32>
    %16 = arith.mulf %15, %7 : vector<16x16xf32>
    %c1_i32_5 = arith.constant 1 : i32
    %17 = vector.broadcast %c1_i32_5 : i32 to vector<16x16xi32>
    %18 = arith.cmpi eq, %3, %17 : vector<16x16xi32>
    %c1_i32_6 = arith.constant 1 : i32
    %19 = vector.broadcast %c1_i32_6 : i32 to vector<16x16xi32>
    %20 = arith.cmpi eq, %5, %19 : vector<16x16xi32>
    %21 = arith.andi %18, %20 : vector<16x16xi1>
    %cst_7 = arith.constant 2.550000e+02 : f32
    %cst_8 = arith.constant 0.000000e+00 : f32
    %22 = vector.broadcast %cst_7 : f32 to vector<16x16xf32>
    %23 = vector.broadcast %cst_8 : f32 to vector<16x16xf32>
    %24 = arith.select %21, %22, %23 : vector<16x16xi1>, vector<16x16xf32>
    %25 = arith.mulf %24, %7 : vector<16x16xf32>
    %26 = arith.cmpi ne, %3, %5 : vector<16x16xi32>
    %cst_9 = arith.constant 2.550000e+02 : f32
    %cst_10 = arith.constant 0.000000e+00 : f32
    %27 = vector.broadcast %cst_9 : f32 to vector<16x16xf32>
    %28 = vector.broadcast %cst_10 : f32 to vector<16x16xf32>
    %29 = arith.select %26, %27, %28 : vector<16x16xi1>, vector<16x16xf32>
    %30 = arith.mulf %29, %7 : vector<16x16xf32>
    %c15_i32 = arith.constant 15 : i32
    %31 = tpu.dynamic_rotate %16 by %c15_i32 dim 1 : vector<16x16xf32>, i32 -> vector<16x16xf32>
    %c15_i32_11 = arith.constant 15 : i32
    %32 = vector.broadcast %c15_i32_11 : i32 to vector<16x16xi32>
    %33 = arith.cmpi sge, %1, %32 : vector<16x16xi32>
    %cst_12 = arith.constant 0.000000e+00 : f32
    %34 = vector.broadcast %cst_12 : f32 to vector<16x16xf32>
    %35 = arith.select %33, %34, %31 : vector<16x16xi1>, vector<16x16xf32>
    %c1_i32_13 = arith.constant 1 : i32
    %36 = tpu.dynamic_rotate %16 by %c1_i32_13 dim 1 : vector<16x16xf32>, i32 -> vector<16x16xf32>
    %c1_i32_14 = arith.constant 1 : i32
    %37 = vector.broadcast %c1_i32_14 : i32 to vector<16x16xi32>
    %38 = arith.cmpi slt, %1, %37 : vector<16x16xi32>
    %cst_15 = arith.constant 0.000000e+00 : f32
    %39 = vector.broadcast %cst_15 : f32 to vector<16x16xf32>
    %40 = arith.select %38, %39, %36 : vector<16x16xi1>, vector<16x16xf32>
    %41 = arith.addf %35, %40 : vector<16x16xf32>
    %cst_16 = arith.constant 5.000000e-01 : f32
    %42 = vector.broadcast %cst_16 : f32 to vector<16x16xf32>
    %43 = arith.mulf %42, %41 : vector<16x16xf32>
    %44 = arith.addf %16, %43 : vector<16x16xf32>
    %c15_i32_17 = arith.constant 15 : i32
    %45 = tpu.dynamic_rotate %25 by %c15_i32_17 dim 1 : vector<16x16xf32>, i32 -> vector<16x16xf32>
    %c15_i32_18 = arith.constant 15 : i32
    %46 = vector.broadcast %c15_i32_18 : i32 to vector<16x16xi32>
    %47 = arith.cmpi sge, %1, %46 : vector<16x16xi32>
    %cst_19 = arith.constant 0.000000e+00 : f32
    %48 = vector.broadcast %cst_19 : f32 to vector<16x16xf32>
    %49 = arith.select %47, %48, %45 : vector<16x16xi1>, vector<16x16xf32>
    %c1_i32_20 = arith.constant 1 : i32
    %50 = tpu.dynamic_rotate %25 by %c1_i32_20 dim 1 : vector<16x16xf32>, i32 -> vector<16x16xf32>
    %c1_i32_21 = arith.constant 1 : i32
    %51 = vector.broadcast %c1_i32_21 : i32 to vector<16x16xi32>
    %52 = arith.cmpi slt, %1, %51 : vector<16x16xi32>
    %cst_22 = arith.constant 0.000000e+00 : f32
    %53 = vector.broadcast %cst_22 : f32 to vector<16x16xf32>
    %54 = arith.select %52, %53, %50 : vector<16x16xi1>, vector<16x16xf32>
    %55 = arith.addf %49, %54 : vector<16x16xf32>
    %cst_23 = arith.constant 5.000000e-01 : f32
    %56 = vector.broadcast %cst_23 : f32 to vector<16x16xf32>
    %57 = arith.mulf %56, %55 : vector<16x16xf32>
    %58 = arith.addf %25, %57 : vector<16x16xf32>
    %c15_i32_24 = arith.constant 15 : i32
    %59 = tpu.dynamic_rotate %30 by %c15_i32_24 dim 1 : vector<16x16xf32>, i32 -> vector<16x16xf32>
    %c15_i32_25 = arith.constant 15 : i32
    %60 = vector.broadcast %c15_i32_25 : i32 to vector<16x16xi32>
    %61 = arith.cmpi sge, %1, %60 : vector<16x16xi32>
    %cst_26 = arith.constant 0.000000e+00 : f32
    %62 = vector.broadcast %cst_26 : f32 to vector<16x16xf32>
    %63 = arith.select %61, %62, %59 : vector<16x16xi1>, vector<16x16xf32>
    %c1_i32_27 = arith.constant 1 : i32
    %64 = tpu.dynamic_rotate %30 by %c1_i32_27 dim 1 : vector<16x16xf32>, i32 -> vector<16x16xf32>
    %c1_i32_28 = arith.constant 1 : i32
    %65 = vector.broadcast %c1_i32_28 : i32 to vector<16x16xi32>
    %66 = arith.cmpi slt, %1, %65 : vector<16x16xi32>
    %cst_29 = arith.constant 0.000000e+00 : f32
    %67 = vector.broadcast %cst_29 : f32 to vector<16x16xf32>
    %68 = arith.select %66, %67, %64 : vector<16x16xi1>, vector<16x16xf32>
    %69 = arith.addf %63, %68 : vector<16x16xf32>
    %cst_30 = arith.constant 0.000000e+00 : f32
    %70 = vector.broadcast %cst_30 : f32 to vector<1x16xf32>
    %c1_i32_31 = arith.constant 1 : i32
    %71 = tpu.dynamic_rotate %44 by %c1_i32_31 dim 0 : vector<16x16xf32>, i32 -> vector<16x16xf32>
    %c1_i32_32 = arith.constant 1 : i32
    %72 = vector.broadcast %c1_i32_32 : i32 to vector<16x16xi32>
    %73 = arith.cmpi slt, %0, %72 : vector<16x16xi32>
    %74 = vector.shape_cast %70 : vector<1x16xf32> to vector<1x16xf32>
    %75 = vector.broadcast %74 : vector<1x16xf32> to vector<16x16xf32>
    %76 = arith.select %73, %75, %71 : vector<16x16xi1>, vector<16x16xf32>
    %c15_i32_33 = arith.constant 15 : i32
    %77 = tpu.dynamic_rotate %44 by %c15_i32_33 dim 0 : vector<16x16xf32>, i32 -> vector<16x16xf32>
    %c15_i32_34 = arith.constant 15 : i32
    %78 = vector.broadcast %c15_i32_34 : i32 to vector<16x16xi32>
    %79 = arith.cmpi sge, %0, %78 : vector<16x16xi32>
    %80 = vector.shape_cast %70 : vector<1x16xf32> to vector<1x16xf32>
    %81 = vector.broadcast %80 : vector<1x16xf32> to vector<16x16xf32>
    %82 = arith.select %79, %81, %77 : vector<16x16xi1>, vector<16x16xf32>
    %83 = arith.addf %76, %82 : vector<16x16xf32>
    %cst_35 = arith.constant 5.000000e-01 : f32
    %84 = vector.broadcast %cst_35 : f32 to vector<16x16xf32>
    %85 = arith.mulf %84, %83 : vector<16x16xf32>
    %86 = arith.addf %44, %85 : vector<16x16xf32>
    %c1_i32_36 = arith.constant 1 : i32
    %87 = tpu.dynamic_rotate %58 by %c1_i32_36 dim 0 : vector<16x16xf32>, i32 -> vector<16x16xf32>
    %c1_i32_37 = arith.constant 1 : i32
    %88 = vector.broadcast %c1_i32_37 : i32 to vector<16x16xi32>
    %89 = arith.cmpi slt, %0, %88 : vector<16x16xi32>
    %90 = vector.shape_cast %70 : vector<1x16xf32> to vector<1x16xf32>
    %91 = vector.broadcast %90 : vector<1x16xf32> to vector<16x16xf32>
    %92 = arith.select %89, %91, %87 : vector<16x16xi1>, vector<16x16xf32>
    %c15_i32_38 = arith.constant 15 : i32
    %93 = tpu.dynamic_rotate %58 by %c15_i32_38 dim 0 : vector<16x16xf32>, i32 -> vector<16x16xf32>
    %c15_i32_39 = arith.constant 15 : i32
    %94 = vector.broadcast %c15_i32_39 : i32 to vector<16x16xi32>
    %95 = arith.cmpi sge, %0, %94 : vector<16x16xi32>
    %96 = vector.shape_cast %70 : vector<1x16xf32> to vector<1x16xf32>
    %97 = vector.broadcast %96 : vector<1x16xf32> to vector<16x16xf32>
    %98 = arith.select %95, %97, %93 : vector<16x16xi1>, vector<16x16xf32>
    %99 = arith.addf %92, %98 : vector<16x16xf32>
    %cst_40 = arith.constant 5.000000e-01 : f32
    %100 = vector.broadcast %cst_40 : f32 to vector<16x16xf32>
    %101 = arith.mulf %100, %99 : vector<16x16xf32>
    %102 = arith.addf %58, %101 : vector<16x16xf32>
    %c1_i32_41 = arith.constant 1 : i32
    %103 = tpu.dynamic_rotate %30 by %c1_i32_41 dim 0 : vector<16x16xf32>, i32 -> vector<16x16xf32>
    %c1_i32_42 = arith.constant 1 : i32
    %104 = vector.broadcast %c1_i32_42 : i32 to vector<16x16xi32>
    %105 = arith.cmpi slt, %0, %104 : vector<16x16xi32>
    %106 = vector.shape_cast %70 : vector<1x16xf32> to vector<1x16xf32>
    %107 = vector.broadcast %106 : vector<1x16xf32> to vector<16x16xf32>
    %108 = arith.select %105, %107, %103 : vector<16x16xi1>, vector<16x16xf32>
    %109 = arith.addf %69, %108 : vector<16x16xf32>
    %c15_i32_43 = arith.constant 15 : i32
    %110 = tpu.dynamic_rotate %30 by %c15_i32_43 dim 0 : vector<16x16xf32>, i32 -> vector<16x16xf32>
    %c15_i32_44 = arith.constant 15 : i32
    %111 = vector.broadcast %c15_i32_44 : i32 to vector<16x16xi32>
    %112 = arith.cmpi sge, %0, %111 : vector<16x16xi32>
    %113 = vector.shape_cast %70 : vector<1x16xf32> to vector<1x16xf32>
    %114 = vector.broadcast %113 : vector<1x16xf32> to vector<16x16xf32>
    %115 = arith.select %112, %114, %110 : vector<16x16xi1>, vector<16x16xf32>
    %116 = arith.addf %109, %115 : vector<16x16xf32>
    %cst_45 = arith.constant 2.500000e-01 : f32
    %117 = vector.broadcast %cst_45 : f32 to vector<16x16xf32>
    %118 = arith.mulf %117, %116 : vector<16x16xf32>
    %119 = arith.addf %30, %118 : vector<16x16xf32>
    %120 = math.roundeven %102 : vector<16x16xf32>
    %cst_46 = arith.constant 0.000000e+00 : f32
    %cst_47 = arith.constant 2.550000e+02 : f32
    %121 = vector.broadcast %cst_46 : f32 to vector<16x16xf32>
    %122 = arith.maximumf %121, %120 : vector<16x16xf32>
    %123 = vector.broadcast %cst_47 : f32 to vector<16x16xf32>
    %124 = arith.minimumf %123, %122 : vector<16x16xf32>
    %cst_48 = arith.constant 0.00392156886 : f32
    %125 = vector.broadcast %cst_48 : f32 to vector<16x16xf32>
    %126 = arith.mulf %124, %125 : vector<16x16xf32>
    %c0_49 = arith.constant 0 : index
    %c0_50 = arith.constant 0 : index
    %c0_51 = arith.constant 0 : index
    %c0_52 = arith.constant 0 : index
    %127 = vector.load %arg4[%c0_49, %c0_50, %c0_51, %c0_52] : memref<1x3x16x16xf32, #tpu.memory_space<vmem>>, vector<1x1x16x16xf32>
    %128 = vector.shape_cast %127 : vector<1x1x16x16xf32> to vector<16x16xf32>
    %129 = vector.shape_cast %126 : vector<16x16xf32> to vector<1x1x16x16xf32>
    tpu.vector_store %arg4[%c0_49, %c0_50, %c0_51, %c0_52], %129 {strides = array<i32>} : memref<1x3x16x16xf32, #tpu.memory_space<vmem>>, vector<1x1x16x16xf32>,
    %130 = math.roundeven %119 : vector<16x16xf32>
    %cst_53 = arith.constant 0.000000e+00 : f32
    %cst_54 = arith.constant 2.550000e+02 : f32
    %131 = vector.broadcast %cst_53 : f32 to vector<16x16xf32>
    %132 = arith.maximumf %131, %130 : vector<16x16xf32>
    %133 = vector.broadcast %cst_54 : f32 to vector<16x16xf32>
    %134 = arith.minimumf %133, %132 : vector<16x16xf32>
    %cst_55 = arith.constant 0.00392156886 : f32
    %135 = vector.broadcast %cst_55 : f32 to vector<16x16xf32>
    %136 = arith.mulf %134, %135 : vector<16x16xf32>
    %c0_56 = arith.constant 0 : index
    %c1 = arith.constant 1 : index
    %c0_57 = arith.constant 0 : index
    %c0_58 = arith.constant 0 : index
    %137 = vector.load %arg4[%c0_56, %c1, %c0_57, %c0_58] : memref<1x3x16x16xf32, #tpu.memory_space<vmem>>, vector<1x1x16x16xf32>
    %138 = vector.shape_cast %137 : vector<1x1x16x16xf32> to vector<16x16xf32>
    %139 = vector.shape_cast %136 : vector<16x16xf32> to vector<1x1x16x16xf32>
    tpu.vector_store %arg4[%c0_56, %c1, %c0_57, %c0_58], %139 {strides = array<i32>} : memref<1x3x16x16xf32, #tpu.memory_space<vmem>>, vector<1x1x16x16xf32>,
    %140 = math.roundeven %86 : vector<16x16xf32>
    %cst_59 = arith.constant 0.000000e+00 : f32
    %cst_60 = arith.constant 2.550000e+02 : f32
    %141 = vector.broadcast %cst_59 : f32 to vector<16x16xf32>
    %142 = arith.maximumf %141, %140 : vector<16x16xf32>
    %143 = vector.broadcast %cst_60 : f32 to vector<16x16xf32>
    %144 = arith.minimumf %143, %142 : vector<16x16xf32>
    %cst_61 = arith.constant 0.00392156886 : f32
    %145 = vector.broadcast %cst_61 : f32 to vector<16x16xf32>
    %146 = arith.mulf %144, %145 : vector<16x16xf32>
    %c0_62 = arith.constant 0 : index
    %c2 = arith.constant 2 : index
    %c0_63 = arith.constant 0 : index
    %c0_64 = arith.constant 0 : index
    %147 = vector.load %arg4[%c0_62, %c2, %c0_63, %c0_64] : memref<1x3x16x16xf32, #tpu.memory_space<vmem>>, vector<1x1x16x16xf32>
    %148 = vector.shape_cast %147 : vector<1x1x16x16xf32> to vector<16x16xf32>
    %149 = vector.shape_cast %146 : vector<16x16xf32> to vector<1x1x16x16xf32>
    tpu.vector_store %arg4[%c0_62, %c2, %c0_63, %c0_64], %149 {strides = array<i32>} : memref<1x3x16x16xf32, #tpu.memory_space<vmem>>, vector<1x1x16x16xf32>,
    return
  }
  func.func @transform_0(%arg0: i32, %arg1: i32) -> (i32, i32, i32) {
    %c0_i32 = arith.constant 0 : i32
    %c0_i32_0 = arith.constant 0 : i32
    return %arg0, %arg1, %c0_i32 : i32, i32, i32
  }
  func.func @transform_2(%arg0: i32, %arg1: i32) -> (i32, i32, i32, i32) {
    %c0_i32 = arith.constant 0 : i32
    %c0_i32_0 = arith.constant 0 : i32
    %c0_i32_1 = arith.constant 0 : i32
    return %arg0, %c0_i32, %arg1, %c0_i32_0 : i32, i32, i32, i32
  }
}

</mosaic_0001>

<bundles_post_ra>
// kernel: tpu_custom_call.1
= control target key start
LH: loop header
LB: loop body
LE: loop exit
PB: predicated region body
PF: predicated region fallthrough
CT: control target
= control target key end

     0   :  { %7 = vsyncpa [#allocation5], 0  ;;  %s1064_s0 = inlined_call_operand.hbm [shape: f32[2,16,16], index: 0, kind: input, shape index: {}]   ;;  %s1065_s1 = inlined_call_operand.hbm [shape: f32[2,16,16], index: 1, kind: input, shape index: {}]   ;;  %s1066_s2 = inlined_call_operand.hbm [shape: f32[2,3,16,16], index: 2, kind: output, shape index: {}]  }
   0x1   :  { %9 = vsyncpa [#allocation5 + $0x1], 0 }
   0x2   :  { %10 = vsyncpa [#allocation6], 0 }
   0x3   :  { %12 = vsyncpa [#allocation6 + $0x1], 0  ;;  %s743_s9 = smov 0   ;;  %s745_s10 = smov 0  }
   0x4   :  { %s747_s11 = smov 0   ;;  %s749_s12 = smov 0  }
   0x5   :  { %s751_s13 = smov 0   ;;  %s753_s14 = smov 0  }
   0x6 LB: > { %s507_s1 = sadd.s32 4294967295, %s716_s14   ;;  %s508_s15 = sadd.s32 4294967294, %s716_s14   ;;  %s716_s14 = sphi %s753_s14, %s18_s14   ;;  %s712_s13 = sphi %s751_s13, %s1081_s13   ;;  %s708_s12 = sphi %s749_s12, %s1080_s12   ;;  %s704_s11 = sphi %s747_s11, %s1079_s11   ;;  %s700_s10 = sphi %s745_s10, %s1078_s10   ;;  %s696_s9 = sphi %s743_s9, %s1077_s9  }
   0x7   : > { %s30_s16 = sadd.s32 1, %s712_s13  ;;  %s39_s17 = sadd.s32 1, %s704_s11 }
   0x8   : > { %p32_p0 = scmp.ge.s32.totalorder %s30_s16, 2  ;;  %p46_p1 = scmp.ne.s32.totalorder %s704_s11, %s700_s10 }
   0x9   : > { %p47_p2 = scmp.eq.s32.totalorder %s716_s14, 0  ;;  %p52_p3 = scmp.ne.s32.totalorder %s700_s10, %s696_s9 }
   0xa   : > { %s1083_s16 = smov (%p32_p0, %s30_s16), 0  ;;  %p53_p5 = scmp.eq.s32.totalorder %s507_s1, 0 }
   0xb   : > { %p784_p4 = por %p47_p2, %p46_p1  ;;  %s34_s19 = ssub.s32 %s712_s13, %s1083_s16 }
   0xc   : > { %p78_p6 = scmp.eq.s32.totalorder %s507_s1, 1  ;;  %p37_p7 = scmp.eq.s32.totalorder %s34_s19, 0 }
   0xd   : > { %p790_p8 = por %p53_p5, %p52_p3  ;;  %p84_p10 = scmp.eq.s32.totalorder %s508_s15, 1 }
   0xe   : > { %p794_p9 = por %p78_p6, %p46_p1  ;;  %p546_p13 = scmp.lt.s32.totalorder %s716_s14, 2 }
   0xf   : > { %s799_s22 = scalar_select %p37_p7, %s704_s11, %s39_s17  }
  0x10   : > { %s1070_s21 = scalar_select %p794_p9, 1, 0 }
  0x11   : > { %p801_p11 = por %p84_p10, %p52_p3  ;;  %s104_s24 = sand.u32 1, %s704_s11  }
  0x12   : > { %s511_s25 = sshll.u32 %s104_s24, 4  ;;  %s525_s26 = sshll.u32 %s712_s13, 8 }
  0x13   : > { %s1071_s23 = scalar_select %p801_p11, 1, 0 }
  0x14   : > { %s812_s29 = scalar_lea.hbm %s1064_s0, %s525_s26  ;;  %s108_s30 = scalar_lea.vmem [#allocation4], %s511_s25 }
  0x15   : > { %s117_s3 = sshll.u32 %s108_s30, 4  ;;  %p818_p0 = pnand %p546_p13, %p784_p4  ;;  %s814_s3 = int_to_ptr.vmem [resolvable:$true] %s117_s3 }
  0x16   : > { %s823_s5 = scalar_lea.sflag [#allocation5], %s104_s24  ;;  %s604_s6 = scalar_lea.hbm %s812_s29, 256 }
  0x17   : > { %p605_p2 = scmp.ne.s32.totalorder %s812_s29, %s604_s6  ;;  %p606_p3 = pneg %p818_p0 }
  0x18   : > { %s609_s1 = scalar_lea.hbm %s1064_s0, 512  ;;  %p610_p4 = scmp.lt.u32.totalorder %s812_s29, %s1064_s0 }
  0x19   : > { %p607_p5 = pnand %p606_p3, %p605_p2  ;;  %p611_p7 = scmp.lt.u32.totalorder %s609_s1, %s604_s6 }
  0x1a   : > { %p613_p13 = scmp.lt.u32.totalorder %s604_s6, %s812_s29 }
  0x1b   : > { %p608_p6 = pneg %p607_p5  ;;  %p612_p10 = por %p611_p7, %p610_p4 }
  0x1d   : > { %p614_p12 = por %p613_p13, %p612_p10 }
  0x1f   : > { %p615_p1 = pnand %p614_p12, %p608_p6 }
  0x21   : > { %618 = shalt.err (!%p615_p1)
}
  0x22   : > { %s619_s18 = scalar_lea.vmem %s814_s3, 256  ;;  %s718_s19 = smov [#allocation4]  }
  0x23   : > { %p620_p2 = scmp.ne.s32.totalorder %s814_s3, %s619_s18  ;;  %s624_s24 = sshll.u32 %s718_s19, 4  ;;  %s625_s24 = int_to_ptr.vmem [resolvable:$false] %s624_s24 }
  0x24   : > { %s626_s25 = scalar_lea.vmem %s625_s24, 512  ;;  %p627_p9 = scmp.lt.s32.totalorder %s814_s3, %s625_s24 }
  0x25   : > { %p622_p5 = pnand %p620_p2, %p606_p3  ;;  %p628_p4 = scmp.lt.s32.totalorder %s626_s25, %s619_s18 }
  0x27   : > { %p623_p11 = pneg %p622_p5  ;;  %p629_p7 = por %p628_p4, %p627_p9 }
  0x29   : > { %p630_p10 = pnand %p629_p7, %p623_p11 }
  0x2b   : > { %633 = shalt.err (!%p630_p10)
}
  0x2c   : > { %s719_s26 = smov 128   ;;  %s720_s27 = smov 8  }
  0x2d   : > { %541 = dma.hbm_to_vmem [thread:$0]  (!%p818_p0), %s812_s29, 256, %s814_s3, %s823_s5, %s719_s26, %s719_s26, %s720_s27  }
  0x2e   : > { %p125_p12 = scmp.lt.s32.totalorder %s716_s14, 3  ;;  %p1073_p1 = scmp.ge.s32.totalorder %s716_s14, 1 }
  0x30   : > { %p126_p3 = pnand %p1073_p1, %p125_p12 }
  0x31   : > { %s855_s28 = sand.u32 (!%p126_p3), 1, %s700_s10  }
  0x32   : > { %129 = sbr.rel (%p126_p3) target bundleno = 475 (0x1db), region = 24  ;;  %s515_s30 = sshll.u32 (!%p126_p3), %s855_s28, 4 }
  0x33   : > { %s132_s6 = scalar_lea.sflag (!%p126_p3), [#allocation5], %s855_s28  ;;  %s135_s7 = scalar_lea.vmem (!%p126_p3), [#allocation4], %s515_s30 }
  0x39   : > { %687 = dma.done.wait (%p790_p8), %s132_s6, 256  }
  0x3a   : > { %689 = vsyncadd (%p790_p8), %s132_s6, 4294967040  ;;  %v156_v0 = vlaneseq  ;;  %v164_v7 = vld [vmem:[%s135_s7] sm:$0xff]  ;;  %v721_v8 = vmov 0.0   ;;  %v165_v10 = vld [vmem:[%s135_s7 + $0x8] sm:$0xff]  ;;  %s722_s20 = smov 16   ;;  %vm190_vm12 = vcmask 1047680  }
  0x3b   : > { %s723_s29 = smov 127   ;;  %s724_s3 = smov 113  }
  0x3c   : > { %v863_v1 = vshrl.u32 %v156_v0, 7  ;;  %v865_v2 = vand.u32 127, %v156_v0  ;;  %s526_s4 = smul.u32 48, %s855_s28  ;;  %p1074_p9 = scmp.ne.s32.totalorder %s1070_s21, 0 }
  0x3d   : > { %s533_s8 = smul.u32 768, %s708_s12  ;;  %s392_s12 = scalar_lea.sflag [#allocation6], %s855_s28 }
  0x3e   : > { %v161_v3 = vand.u32 1, %v863_v1  ;;  %v163_v4 = vand.u32 1, %v865_v2  ;;  %v870_v5 = vadd.s32 8, %v863_v1  ;;  %vm203_vm13 = vcmp.ge.s32.totalorder %v865_v2, 15  ;;  %s153_s5 = scalar_lea.vmem [#allocation7], %s526_s4  ;;  %s725_s24 = smov [#allocation7]  }
  0x3f   : > { %vm214_vm14 = vcmp.lt.s32.totalorder %v865_v2, 1  ;;  %vm299_vm15 = vcmp.lt.s32.totalorder %v863_v1, 1  ;;  %s407_s1 = sshll.u32 %s153_s5, 4  ;;  %s1012_s18 = scalar_lea.hbm %s1066_s2, %s533_s8  ;;  %s1014_s1 = int_to_ptr.vmem [resolvable:$true] %s407_s1 }
  0x40   : > { %vm166_vm0 = vcmp.eq.s32.totalorder %v161_v3, 0  ;;  %vm168_vm1 = vcmp.eq.s32.totalorder %v163_v4, 0  ;;  %v162_v6 = vand.u32 1, %v870_v5  ;;  %vm175_vm3 = vcmp.eq.s32.totalorder %v161_v3, 1  ;;  %s634_s19 = scalar_lea.vmem %s1014_s1, 768  ;;  %s638_s25 = sshll.u32 %s725_s24, 4  ;;  %s639_s25 = int_to_ptr.vmem [resolvable:$false] %s638_s25 }
  0x41   : > { %vm169_vm2 = vmand %vm166_vm0, %vm168_vm1  ;;  %vm177_vm4 = vcmp.eq.s32.totalorder %v163_v4, 1  ;;  %vm184_vm7 = vcmp.ne.s32.totalorder %v161_v3, %v163_v4  ;;  %vm307_vm0 = vcmp.lt.s32.totalorder %v863_v1, 7  ;;  %p635_p8 = scmp.ne.s32.totalorder %s1014_s1, %s634_s19  ;;  %s640_s26 = scalar_lea.vmem %s639_s25, 1536 }
  0x42   : > { %v171_v9 = vsel %vm169_vm2, 255.0, %v721_v8  ;;  %vm167_vm5 = vcmp.eq.s32.totalorder %v162_v6, 0  ;;  %vm178_vm6 = vmand %vm175_vm3, %vm177_vm4  ;;  %vm176_vm9 = vcmp.eq.s32.totalorder %v162_v6, 1  ;;  %vm185_vm10 = vcmp.ne.s32.totalorder %v162_v6, %v163_v4  ;;  %p641_p6 = scmp.lt.s32.totalorder %s1014_s1, %s639_s25  ;;  %p642_p13 = scmp.lt.s32.totalorder %s640_s26, %s634_s19 }
  0x43   : > { %v873_v11 = vmul.f32 %v171_v9, %v164_v7  ;;  %vm170_vm8 = vmand %vm167_vm5, %vm168_vm1  ;;  %v180_v12 = vsel %vm178_vm6, 255.0, %v721_v8  ;;  %v186_v17 = vsel %vm184_vm7, 255.0, %v721_v8  ;;  %v187_v19 = vsel %vm185_vm10, 255.0, %v721_v8  ;;  %p636_p11 = pnand %p635_p8, %p1074_p9 }
  0x44   : > { %v172_v13 = vsel %vm170_vm8, 255.0, %v721_v8  ;;  %v875_v14 = vmul.f32 %v180_v12, %v164_v7  ;;  %vm179_vm11 = vmand %vm176_vm9, %vm177_vm4  ;;  %v885_v20 = vmul.f32 %v186_v17, %v164_v7  ;;  %v889_v21 = vmul.f32 %v187_v19, %v165_v10  ;;  %p643_p2 = por %p642_p13, %p641_p6 }
  0x45   : > { %191 = vrot.lane.b32.xlu0 %v873_v11, %s722_s20  ;;  %v879_v15 = vmul.f32 %v172_v13, %v165_v10  ;;  %v181_v16 = vsel %vm179_vm11, 255.0, %v721_v8  ;;  %vm311_vm1 = vcmp.ge.s32.totalorder %v870_v5, 15  ;;  %vm366_vm2 = vcmask 130048   ;;  %p637_p0 = pneg %p636_p11 }
  0x46   : > { %229 = vrot.lane.b32.xlu1 %v875_v14, %s722_s20  ;;  %v883_v18 = vmul.f32 %v181_v16, %v165_v10  ;;  %v338_v59 = vrot.slane %v885_v20, 7  ;;  %v339_v60 = vrot.slane %v889_v21, 7  ;;  %v346_v19 = vrot.slane %v885_v20, 1 }
  0x47   : > { %p644_p5 = pnand %p643_p2, %p637_p0 }
  0x48   : > { %v341_v8 = vsel %vm299_vm15, %v339_v60, %v338_v59 }
  0x49   : > { %194 = vrot.lane.b32.xlu0 %v879_v15, %s722_s20 }
  0x4a   : > { %232 = vrot.lane.b32.xlu1 %v883_v18, %s722_s20 }
  0x4d   : > { %265 = vrot.lane.b32.xlu0 %v885_v20, %s722_s20 }
  0x4e   : > { %268 = vrot.lane.b32.xlu1 %v889_v21, %s722_s20 }
  0xb7   : > { %v192_v22 = vpop.permute.xlu0 %191 }
  0xb8   : > { %v193_v23 = vsel %vm190_vm12, %v192_v22, %v873_v11  ;;  %v230_v24 = vpop.permute.xlu1 %229  ;;  %v347_v22 = vrot.slane %v889_v21, 1 }
  0xb9   : > { %197 = vrot.lane.b32.xlu0 %v193_v23, %s722_s20  ;;  %v231_v25 = vsel %vm190_vm12, %v230_v24, %v875_v14 }
  0xbb   : > { %v195_v26 = vpop.permute.xlu0 %194 }
  0xbc   : > { %v196_v27 = vsel %vm190_vm12, %v195_v26, %v879_v15  ;;  %v233_v28 = vpop.permute.xlu1 %232 }
  0xbd   : > { %199 = vrot.lane.b32.xlu1 %v196_v27, %s722_s20  ;;  %235 = vrot.lane.b32.xlu0 %v231_v25, %s722_s20  ;;  %v234_v29 = vsel %vm190_vm12, %v233_v28, %v883_v18 }
  0xbf   : > { %v266_v30 = vpop.permute.xlu0 %265 }
  0xc0   : > { %v267_v31 = vsel %vm190_vm12, %v266_v30, %v885_v20  ;;  %v269_v32 = vpop.permute.xlu1 %268 }
  0xc1   : > { %237 = vrot.lane.b32.xlu1 %v234_v29, %s722_s20  ;;  %271 = vrot.lane.b32.xlu0 %v267_v31, %s722_s20  ;;  %v270_v33 = vsel %vm190_vm12, %v269_v32, %v889_v21 }
  0xc5   : > { %273 = vrot.lane.b32.xlu1 %v270_v33, %s722_s20 }
 0x12b   : > { %v198_v34 = vpop.permute.xlu0 %197 }
 0x12c   : > { %v201_v35 = vsel %vm190_vm12, %v198_v34, %v873_v11 }
 0x12d   : > { %206 = vrot.lane.b32.xlu0 %v201_v35, %s723_s29 }
 0x12f   : > { %v200_v36 = vpop.permute.xlu1 %199  ;;  %v236_v37 = vpop.permute.xlu0 %235 }
 0x130   : > { %v202_v38 = vsel %vm190_vm12, %v200_v36, %v879_v15  ;;  %v239_v39 = vsel %vm190_vm12, %v236_v37, %v875_v14  ;;  %v342_v37 = vsel %vm299_vm15, 0.0, %v341_v8 }
 0x131   : > { %208 = vrot.lane.b32.xlu1 %v202_v38, %s723_s29  ;;  %215 = vrot.lane.b32.xlu0 %v201_v35, %s724_s3 }
 0x133   : > { %v238_v40 = vpop.permute.xlu1 %237  ;;  %v272_v42 = vpop.permute.xlu0 %271 }
 0x134   : > { %v240_v41 = vsel %vm190_vm12, %v238_v40, %v883_v18  ;;  %v275_v43 = vsel %vm190_vm12, %v272_v42, %v885_v20 }
 0x135   : > { %217 = vrot.lane.b32.xlu1 %v202_v38, %s724_s3  ;;  %243 = vrot.lane.b32.xlu0 %v239_v39, %s723_s29  ;;  %v348_v38 = vsel %vm307_vm0, %v346_v19, %v347_v22 }
 0x137   : > { %v274_v44 = vpop.permute.xlu1 %273 }
 0x138   : > { %v276_v45 = vsel %vm190_vm12, %v274_v44, %v889_v21 }
 0x139   : > { %245 = vrot.lane.b32.xlu1 %v240_v41, %s723_s29  ;;  %251 = vrot.lane.b32.xlu0 %v239_v39, %s724_s3 }
 0x13d   : > { %253 = vrot.lane.b32.xlu1 %v240_v41, %s724_s3  ;;  %279 = vrot.lane.b32.xlu0 %v275_v43, %s723_s29  ;;  %v340_v41 = vsel %vm299_vm15, %v338_v59, %v339_v60 }
 0x141   : > { %281 = vrot.lane.b32.xlu1 %v276_v45, %s723_s29  ;;  %287 = vrot.lane.b32.xlu0 %v275_v43, %s724_s3 }
 0x145   : > { %289 = vrot.lane.b32.xlu1 %v276_v45, %s724_s3  ;;  %v349_v45 = vsel %vm307_vm0, %v347_v22, %v346_v19 }
 0x19f   : > { %v207_v46 = vpop.permute.xlu0 %206 }
 0x1a0   : > { %v212_v49 = vsel %vm203_vm13, 0.0, %v207_v46 }
 0x1a3   : > { %v209_v47 = vpop.permute.xlu1 %208  ;;  %v216_v48 = vpop.permute.xlu0 %215 }
 0x1a4   : > { %v221_v50 = vsel %vm214_vm14, 0.0, %v216_v48  ;;  %v213_v55 = vsel %vm203_vm13, 0.0, %v209_v47 }
 0x1a5   : > { %v223_v51 = vadd.f32 %v221_v50, %v212_v49 }
 0x1a7   : > { %v225_v52 = vmul.f32 0.5, %v223_v51  ;;  %v218_v53 = vpop.permute.xlu1 %217  ;;  %v244_v54 = vpop.permute.xlu0 %243 }
 0x1a8   : > { %v222_v56 = vsel %vm214_vm14, 0.0, %v218_v53  ;;  %v249_v0 = vsel %vm203_vm13, 0.0, %v244_v54 }
 0x1a9   : > { %v224_v57 = vadd.f32 %v222_v56, %v213_v55  ;;  %v227_v58 = vadd.f32 %v225_v52, %v873_v11  ;;  %v351_v56 = vsel %vm311_vm1, 0.0, %v349_v45 }
 0x1ab   : > { %v226_v61 = vmul.f32 0.5, %v224_v57  ;;  %v246_v62 = vpop.permute.xlu1 %245  ;;  %v252_v63 = vpop.permute.xlu0 %251  ;;  %v297_v7 = vrot.slane %v227_v58, 7  ;;  %v305_v9 = vrot.slane %v227_v58, 1 }
 0x1ac   : > { %v257_v3 = vsel %vm214_vm14, 0.0, %v252_v63  ;;  %v250_v17 = vsel %vm203_vm13, 0.0, %v246_v62 }
 0x1ad   : > { %v228_v4 = vadd.f32 %v226_v61, %v879_v15  ;;  %v259_v6 = vadd.f32 %v257_v3, %v249_v0 }
 0x1af   : > { %v298_v10 = vrot.slane %v228_v4, 7  ;;  %v306_v11 = vrot.slane %v228_v4, 1  ;;  %v261_v12 = vmul.f32 0.5, %v259_v6  ;;  %v254_v13 = vpop.permute.xlu1 %253  ;;  %v280_v16 = vpop.permute.xlu0 %279 }
 0x1b0   : > { %v258_v15 = vsel %vm214_vm14, 0.0, %v254_v13  ;;  %v285_v33 = vsel %vm203_vm13, 0.0, %v280_v16 }
 0x1b1   : > { %v300_v23 = vsel %vm299_vm15, %v297_v7, %v298_v10  ;;  %v301_v24 = vsel %vm299_vm15, %v298_v10, %v297_v7  ;;  %v308_v25 = vsel %vm307_vm0, %v305_v9, %v306_v11  ;;  %v309_v26 = vsel %vm307_vm0, %v306_v11, %v305_v9 }
 0x1b2   : > { %v303_v27 = vsel %vm299_vm15, 0.0, %v301_v24  ;;  %v313_v28 = vsel %vm311_vm1, 0.0, %v309_v26  ;;  %v263_v29 = vadd.f32 %v261_v12, %v875_v14  ;;  %v260_v30 = vadd.f32 %v258_v15, %v250_v17 }
 0x1b3   : > { %v314_v31 = vadd.f32 %v308_v25, %v303_v27  ;;  %v315_v32 = vadd.f32 %v313_v28, %v300_v23  ;;  %v282_v34 = vpop.permute.xlu1 %281  ;;  %v288_v35 = vpop.permute.xlu0 %287 }
 0x1b4   : > { %v262_v36 = vmul.f32 0.5, %v260_v30  ;;  %v293_v14 = vsel %vm214_vm14, 0.0, %v288_v35  ;;  %v320_v42 = vrot.slane %v263_v29, 7  ;;  %v326_v48 = vrot.slane %v263_v29, 1 }
 0x1b5   : > { %v316_v39 = vmul.f32 0.5, %v314_v31  ;;  %v317_v40 = vmul.f32 0.5, %v315_v32  ;;  %v295_v44 = vadd.f32 %v293_v14, %v285_v33  ;;  %v286_v49 = vsel %vm203_vm13, 0.0, %v282_v34 }
 0x1b6   : > { %v264_v43 = vadd.f32 %v262_v36, %v883_v18 }
 0x1b7   : > { %v318_v46 = vadd.f32 %v316_v39, %v227_v58  ;;  %v319_v47 = vadd.f32 %v317_v40, %v228_v4  ;;  %v290_v50 = vpop.permute.xlu1 %289  ;;  %v344_v53 = vadd.f32 %v342_v37, %v295_v44 }
 0x1b8   : > { %v321_v51 = vrot.slane %v264_v43, 7  ;;  %v327_v52 = vrot.slane %v264_v43, 1  ;;  %v294_v54 = vsel %vm214_vm14, 0.0, %v290_v50 }
 0x1b9   : > { %v531_v55 = vround.rtne.f32 %v318_v46  ;;  %v532_v18 = vround.rtne.f32 %v319_v47  ;;  %v296_v57 = vadd.f32 %v294_v54, %v286_v49  ;;  %v352_v6 = vadd.f32 %v348_v38, %v344_v53 }
 0x1ba   : > { %v322_v58 = vsel %vm299_vm15, %v320_v42, %v321_v51  ;;  %v323_v59 = vsel %vm299_vm15, %v321_v51, %v320_v42  ;;  %v328_v60 = vsel %vm307_vm0, %v326_v48, %v327_v52  ;;  %v329_v2 = vsel %vm307_vm0, %v327_v52, %v326_v48 }
 0x1bb   : > { %v382_v61 = vmax.f32 %v531_v55, 0.0  ;;  %v383_v62 = vmax.f32 %v532_v18, 0.0  ;;  %v324_v63 = vsel %vm299_vm15, 0.0, %v323_v59  ;;  %v331_v0 = vsel %vm311_vm1, 0.0, %v329_v2 }
 0x1bc   : > { %v332_v3 = vadd.f32 %v328_v60, %v324_v63  ;;  %v333_v4 = vadd.f32 %v331_v0, %v322_v58  ;;  %v345_v7 = vadd.f32 %v340_v41, %v296_v57  ;;  %v354_v12 = vmul.f32 0.25, %v352_v6 }
 0x1bd   : > { %v384_v8 = vmin.f32 %v382_v61, 255.0  ;;  %v385_v9 = vmin.f32 %v383_v62, 255.0 }
 0x1be   : > { %v334_v10 = vmul.f32 0.5, %v332_v3  ;;  %v335_v11 = vmul.f32 0.5, %v333_v4  ;;  %v353_v13 = vadd.f32 %v351_v56, %v345_v7  ;;  %v356_v1 = vadd.f32 %v354_v12, %v885_v20 }
 0x1bf   : > { %v386_v16 = vmul.f32 0.003921569, %v384_v8  ;;  %v387_v17 = vmul.f32 0.003921569, %v385_v9 }
 0x1c0   : > { %v336_v15 = vadd.f32 %v334_v10, %v263_v29  ;;  %v337_v19 = vadd.f32 %v335_v11, %v264_v43  ;;  %v355_v22 = vmul.f32 0.25, %v353_v13  ;;  %v529_v24 = vround.rtne.f32 %v356_v1 }
 0x1c1   : > { %518 = vst.msk [vmem:[%s153_s5 + $0x20] sm:$0xff] %vm366_vm2, %v386_v16  ;;  %519 = vst.msk [vmem:[%s153_s5 + $0x28] sm:$0xff] %vm366_vm2, %v387_v17 }
 0x1c2   : > { %v527_v5 = vround.rtne.f32 %v336_v15  ;;  %v528_v23 = vround.rtne.f32 %v337_v19  ;;  %v357_v25 = vadd.f32 %v355_v22, %v889_v21  ;;  %v371_v28 = vmax.f32 %v529_v24, 0.0 }
 0x1c4   : > { %v360_v26 = vmax.f32 %v527_v5, 0.0  ;;  %v361_v27 = vmax.f32 %v528_v23, 0.0  ;;  %v530_v30 = vround.rtne.f32 %v357_v25  ;;  %v373_v20 = vmin.f32 %v371_v28, 255.0 }
 0x1c6   : > { %v362_v29 = vmin.f32 %v360_v26, 255.0  ;;  %v363_v31 = vmin.f32 %v361_v27, 255.0  ;;  %v372_v32 = vmax.f32 %v530_v30, 0.0  ;;  %v375_v35 = vmul.f32 0.003921569, %v373_v20 }
 0x1c8   : > { %v364_v33 = vmul.f32 0.003921569, %v362_v29  ;;  %v365_v34 = vmul.f32 0.003921569, %v363_v31  ;;  %v374_v36 = vmin.f32 %v372_v32, 255.0  ;;  %516 = vst.msk [vmem:[%s153_s5 + $0x10] sm:$0xff] %vm366_vm2, %v375_v35 }
 0x1ca   : > { %367 = vst.msk [vmem:[%s153_s5] sm:$0xff] %vm366_vm2, %v364_v33  ;;  %368 = vst.msk [vmem:[%s153_s5 + $0x8] sm:$0xff] %vm366_vm2, %v365_v34  ;;  %v376_v21 = vmul.f32 0.003921569, %v374_v36 }
 0x1cc   : > { %517 = vst.msk [vmem:[%s153_s5 + $0x18] sm:$0xff] %vm366_vm2, %v376_v21 }
 0x1cd   : > { %647 = shalt.err (!%p644_p5)
}
 0x1ce   : > { %s648_s27 = scalar_lea.hbm %s1012_s18, 768  ;;  %s652_s7 = scalar_lea.hbm %s1066_s2, 1536 }
 0x1cf   : > { %p649_p4 = scmp.ne.s32.totalorder %s1012_s18, %s648_s27  ;;  %p653_p12 = scmp.lt.u32.totalorder %s1012_s18, %s1066_s2 }
 0x1d0   : > { %p654_p1 = scmp.lt.u32.totalorder %s652_s7, %s648_s27  ;;  %p656_p8 = scmp.lt.u32.totalorder %s648_s27, %s1012_s18 }
 0x1d1   : > { %p650_p7 = pnand %p649_p4, %p1074_p9 }
 0x1d2   : > { %p655_p3 = por %p654_p1, %p653_p12 }
 0x1d3   : > { %p651_p10 = pneg %p650_p7 }
 0x1d4   : > { %p657_p11 = por %p656_p8, %p655_p3 }
 0x1d6   : > { %p658_p0 = pnand %p657_p11, %p651_p10 }
 0x1d8   : > { %661 = shalt.err (!%p658_p0)
}
 0x1d9   : > { %s726_s3 = smov 128   ;;  %s727_s4 = smov 8  }
 0x1da   : > { %536 = dma.vmem_to_hbm [thread:$0]  (%p1074_p9), %s1014_s1, 768, %s1012_s18, %s392_s12, %s726_s3, %s726_s3, %s727_s4  }
 0x1db PF: > { %s422_s5 = sand.u32 1, %s696_s9   ;;  %p1075_p6 = scmp.ne.s32.totalorder %s1071_s23, 0 }
 0x1dc   : > { %p1076_p13 = scmp.ge.s32.totalorder %s716_s14, 2  ;;  %s423_s8 = scalar_lea.sflag [#allocation6], %s422_s5 }
 0x1de   : > { %p543_p2 = pnand %p1076_p13, %p1075_p6 }
 0x1e0   : > { %691 = dma.done.wait (!%p543_p2), %s423_s8, 768  }
 0x1e1   : > { %693 = vsyncadd (!%p543_p2), %s423_s8, 4294966528  ;;  %s18_s14 = sadd.s32 1, %s716_s14   ;;  %s1077_s9 = smov %s700_s10 }
 0x1e2   : > { %p15_p5 = scmp.ge.s32.totalorder %s18_s14, 4   ;;  %s1078_s10 = smov %s704_s11 }
 0x1e3   : > { %s1079_s11 = smov %s799_s22  ;;  %s1080_s12 = smov %s712_s13 }
 0x1e4   : > { %s1081_s13 = smov %s1083_s16  ;;  %17 = sbr.rel (!%p15_p5) target bundleno = 6 (0x6), region = 72 }
 0x1eb   :  { %428 = vsyncpa [#allocation5], 1 }
 0x1ec   :  { %430 = vsyncpa [#allocation5 + $0x1], 1 }
 0x1ed   :  { %431 = vsyncpa [#allocation6], 1 }
 0x1ee   :  { %433 = vsyncpa [#allocation6 + $0x1], 1 }
 0x1ef   :  { %434 = vsyncmov [#allocation3] }
 0x1f2   :  { %s435_s21 = vpop.sfrf %434 }
 0x1f3   :  { %p523_p9 = scmp.ne.s32.totalorder %s435_s21, 0 }
 0x1f5   :  { %439 = shalt.err (%p523_p9)  }
 0x1f6   :  { %441 = vsyncmov [#allocation3 + $0x1] }
 0x1f9   :  { %s442_s23 = vpop.sfrf %441 }
 0x1fa   :  { %p524_p4 = scmp.ne.s32.totalorder %s442_s23, 0 }
 0x1fc   :  { %446 = shalt.err (%p524_p4)  }

</bundles_post_ra>
